<compile_context>
chip_gen: v7x
topology: tpu7x:2x2x1
jax: 0.10.0
libtpu: 0.0.40
codegen_flags: <defaults>
</compile_context>

<pallas_src>
import functools

import jax
import jax.numpy as jnp
from jax.experimental import pallas as pl
from jax.experimental.pallas import tpu as pltpu


LARGE_NUMBER = 600.0


def _pool_kernel(d_ref, m_ref, d_out_ref, m_out_ref, *, stride, w_in, w_out,
                 large):
    """One block.

    d_ref, m_ref : (NB, TH, stride * w_in)  -- each row holds the `stride`
                   original image rows of one pooling window packed
                   back-to-back along the lane dimension.
    d_out_ref, m_out_ref : (NB, TH, w_out)
    """
    s = stride
    vmin = None   # running min of the encoded depth  (1 - m) * L + d
    mmax = None   # running max of the mask
    # ---- pool along H: phase r of each output row lives at lanes
    #      [r*w_in, (r+1)*w_in) -> contiguous lane slices (at most a lane
    #      rotate when w_in % 128 != 0; hidden under the HBM DMA).
    #      The f32 upcast happens here, per-slice, in VMEM (no HBM pass).
    for r in range(s):
        d_r = d_ref[:, :, r * w_in:(r + 1) * w_in].astype(jnp.float32)
        m_r = m_ref[:, :, r * w_in:(r + 1) * w_in].astype(jnp.float32)
        v_r = d_r + (1.0 - m_r) * large
        vmin = v_r if vmin is None else jnp.minimum(vmin, v_r)
        mmax = m_r if mmax is None else jnp.maximum(mmax, m_r)
    # ---- pool along W: split the lane dim into (w_out, s) windows and reduce
    #      the trailing window axis.  Lane decimation by `s` is unavoidable
    #      with a zero-copy host layout; this reshape+reduce form is the one
    #      Mosaic is known to lower, and its temporaries are accounted for in
    #      the tile budget below.
    nb, th, _ = vmin.shape
    vmin = jnp.min(vmin.reshape(nb, th, w_out, s), axis=-1)   # (NB, TH, w_out)
    mmax = jnp.max(mmax.reshape(nb, th, w_out, s), axis=-1)
    d_out_ref[...] = (vmin - (1.0 - mmax) * large).astype(d_out_ref.dtype)
    m_out_ref[...] = mmax.astype(m_out_ref.dtype)


_TH_LADDER = (1024, 512, 256, 128, 64, 32, 16)


def _choose_tiles(nc, h_out, row_in_bytes, row_tmp_bytes, row_out_bytes):
    """Fixed-ladder tile chooser (cdiv grid handles ragged last blocks).

    Live VMEM per grid step ~= 2 * inputs (double-buffered) + f32 temporaries
    + 2 * outputs; budget ~10 MiB against the explicit 32 MiB vmem limit, which
    keeps blocks near/above the ~512 KiB roofline knee while leaving slack on
    every TPU generation (tightest: v5e).
    """
    budget = 10 * 1024 * 1024
    per_row = 2 * row_in_bytes + row_tmp_bytes + 2 * row_out_bytes
    max_rows = max(16, budget // per_row)

    th_cap = next((t for t in _TH_LADDER if t <= max_rows), 16)
    # Maximize the row block first (lane-dense blocks, fewer grid steps), then
    # fill leftover budget with batch entries.
    th = h_out if h_out <= th_cap else th_cap         # full extent or mult of 16
    nb = max(1, min(nc, max_rows // max(th, 1)))

    def n_steps(nb_, th_):
        return -(-nc // nb_) * (-(-h_out // th_))

    # v7x has 2 TensorCores: want >=2 grid steps (ideally >=8 so DMA/compute
    # pipelining survives).  Shrink nb first (keeps th maximal), then th.
    while n_steps(nb, th) < 8 and nb > 1:
        nb = max(1, nb // 2)
    if n_steps(nb, th) < 2 and th == h_out and h_out >= 32:
        th = next((t for t in _TH_LADDER if t <= h_out // 2), 16)
    return nb, th


def sparse_downsample_close(d, mask, stride, large_number=LARGE_NUMBER,
                            tile_override=None):
    """Pallas equivalent of SparseDownSampleClose.forward.

    d, mask : (N, C, H, W) floating arrays.  They are consumed in their native
              dtypes (pass the mask as bf16 to cut HBM read traffic ~25%); the
              upcast to f32 happens inside the kernel.
    stride  : python int pooling window / stride.
    Returns : (d_result, mask_result) of shape (N, C, H//stride, W//stride);
              d_result has promote(d, mask) dtype, mask_result has mask.dtype.
    """
    assert d.ndim == 4 and d.shape == mask.shape
    assert jnp.issubdtype(d.dtype, jnp.floating)
    assert jnp.issubdtype(mask.dtype, jnp.floating)
    n, c, h, w = d.shape
    s = int(stride)
    h_out, w_out = h // s, w // s
    assert h_out > 0 and w_out > 0, "input smaller than pooling window"
    hc, wc = h_out * s, w_out * s

    # MaxPool2d floors: crop the ragged remainder.  Divisible shapes skip this
    # entirely; only non-divisible inputs pay the extra pass (the lane-packing
    # reshape below needs a contiguous (nc, h_out, s*wc) view).
    if (hc, wc) != (h, w):
        d = d[:, :, :hc, :wc]
        mask = mask[:, :, :hc, :wc]

    nc = n * c
    # Free, metadata-only reshape: collapse N*C and pack the `s` rows of each
    # pooling window back-to-back along the lane dimension -> lane-dense blocks.
    d2 = d.reshape(nc, h_out, s * wc)
    m2 = mask.reshape(nc, h_out, s * wc)

    d_out_dtype = jnp.promote_types(d.dtype, mask.dtype)
    m_out_dtype = mask.dtype
    out_itemsize = (jnp.dtype(d_out_dtype).itemsize
                    + jnp.dtype(m_out_dtype).itemsize)

    row_in_bytes = s * wc * (d.dtype.itemsize + mask.dtype.itemsize)
    row_tmp_bytes = 6 * wc * 4          # f32 v_r / vmin / mmax + relayout slack
    row_out_bytes = w_out * out_itemsize
    if tile_override is not None:
        nb, th = tile_override
    else:
        nb, th = _choose_tiles(nc, h_out, row_in_bytes, row_tmp_bytes,
                               row_out_bytes)

    grid = (pl.cdiv(nc, nb), pl.cdiv(h_out, th))
    in_spec = pl.BlockSpec((nb, th, s * wc), lambda b, r: (b, r, 0))
    out_spec = pl.BlockSpec((nb, th, w_out), lambda b, r: (b, r, 0))

    kernel = functools.partial(_pool_kernel, stride=s, w_in=wc, w_out=w_out,
                               large=float(large_number))

    cost = pl.CostEstimate(
        flops=int(7 * nc * hc * wc),
        transcendentals=0,
        bytes_accessed=int(nc * hc * wc * (d.dtype.itemsize
                                           + mask.dtype.itemsize)
                           + nc * h_out * w_out * out_itemsize),
    )

    d_ds, m_ds = pl.pallas_call(
        kernel,
        out_shape=(jax.ShapeDtypeStruct((nc, h_out, w_out), d_out_dtype),
                   jax.ShapeDtypeStruct((nc, h_out, w_out), m_out_dtype)),
        grid=grid,
        in_specs=[in_spec, in_spec],
        out_specs=(out_spec, out_spec),
        compiler_params=pltpu.CompilerParams(
            dimension_semantics=("parallel", "parallel"),
            vmem_limit_bytes=32 * 1024 * 1024),
        cost_estimate=cost,
    )(d2, m2)

    return (d_ds.reshape(n, c, h_out, w_out),
            m_ds.reshape(n, c, h_out, w_out))


def _reference(d, mask, stride, large_number=LARGE_NUMBER):
    """Pure-JAX reference implementing the exact torch formula (in f32)."""
    n, c, h, w = d.shape
    s = stride
    h_out, w_out = h // s, w // s
    d = d[:, :, :h_out * s, :w_out * s].astype(jnp.float32)
    mask = mask[:, :, :h_out * s, :w_out * s].astype(jnp.float32)
    encode_d = -(1.0 - mask) * large_number - d
    pooled = jnp.max(encode_d.reshape(n, c, h_out, s, w_out, s), axis=(3, 5))
    mask_result = jnp.max(mask.reshape(n, c, h_out, s, w_out, s), axis=(3, 5))
    d_result = -pooled - (1.0 - mask_result) * large_number
    return d_result, mask_result


def _check(d, mask, stride, tile_override=None):
    d_out, m_out = sparse_downsample_close(d, mask, stride,
                                           tile_override=tile_override)
    d_out, m_out = jax.block_until_ready((d_out, m_out))
    d_ref, m_ref = _reference(d, mask, stride)
    n, c, h, w = d.shape
    assert d_out.shape == (n, c, h // stride, w // stride), d_out.shape
    assert m_out.shape == (n, c, h // stride, w // stride), m_out.shape
    assert jnp.allclose(d_out.astype(jnp.float32), d_ref,
                        atol=1e-4, rtol=1e-5), "d_result mismatch"
    assert jnp.allclose(m_out.astype(jnp.float32), m_ref,
                        atol=1e-6, rtol=0.0), "mask_result mismatch"


if __name__ == "__main__":
    key = jax.random.PRNGKey(0)
    k1, k2, k3, k4, k5, k6 = jax.random.split(key, 6)

    # 1) Divisible shape, f32 depth + bf16 mask (mask stays bf16 in HBM and is
    #    upcast inside the kernel; mask_result comes back as bf16).
    n, c, h, w = 2, 4, 16, 16
    d = jax.random.uniform(k1, (n, c, h, w), dtype=jnp.float32) * 10.0
    m = (jax.random.uniform(k2, (n, c, h, w)) > 0.5).astype(jnp.bfloat16)
    _check(d, m, stride=2)

    # 2) Ragged (non-divisible) H/W with stride 4 — exercises the floor-crop
    #    path and a non-power-of-two w_out, all f32.
    n, c, h, w = 2, 3, 37, 45
    d = jax.random.uniform(k3, (n, c, h, w), dtype=jnp.float32) * 5.0
    m = (jax.random.uniform(k4, (n, c, h, w)) > 0.6).astype(jnp.float32)
    _check(d, m, stride=4)

    # 3) Forced small tile so the cdiv grid has a *partial* last row block
    #    (h_out = 22 -> row blocks of 16 + ragged 6), bf16 mask again.
    n, c, h, w = 1, 2, 44, 32
    d = jax.random.uniform(k5, (n, c, h, w), dtype=jnp.float32) * 3.0
    m = (jax.random.uniform(k6, (n, c, h, w)) > 0.4).astype(jnp.bfloat16)
    _check(d, m, stride=2, tile_override=(1, 16))

    print("KERNEL_OK")
</pallas_src>

<mosaic_0001>
module attributes {stable_mosaic.version = 11 : i64} {
  func.func @_pool_kernel(%arg0: i32, %arg1: i32, %arg2: memref<1x8x32xf32, #tpu.memory_space<vmem>>, %arg3: memref<1x8x32xbf16, #tpu.memory_space<vmem>>, %arg4: memref<1x8x8xf32, #tpu.memory_space<vmem>>, %arg5: memref<1x8x8xbf16, #tpu.memory_space<vmem>>) attributes {dimension_semantics = [#tpu.dimension_semantics<parallel>, #tpu.dimension_semantics<parallel>], iteration_bounds = array<i64: 8, 1>, scalar_prefetch = 0 : i64, scratch_operands = 0 : i64, tpu.core_type = #tpu.core_type<tc>, window_params = [{transform_indices = @transform_0, window_bounds = array<i64: 1, 8, 32>}, {transform_indices = @transform_1, window_bounds = array<i64: 1, 8, 32>}, {transform_indices = @transform_2, window_bounds = array<i64: 1, 8, 8>}, {transform_indices = @transform_3, window_bounds = array<i64: 1, 8, 8>}]} {
    %c0 = arith.constant 0 : index
    %c0_0 = arith.constant 0 : index
    %c0_1 = arith.constant 0 : index
    %0 = vector.load %arg2[%c0, %c0_0, %c0_1] : memref<1x8x32xf32, #tpu.memory_space<vmem>>, vector<1x8x16xf32>
    %c0_2 = arith.constant 0 : index
    %c0_3 = arith.constant 0 : index
    %c0_4 = arith.constant 0 : index
    %1 = vector.load %arg3[%c0_2, %c0_3, %c0_4] : memref<1x8x32xbf16, #tpu.memory_space<vmem>>, vector<1x8x16xbf16>
    %2 = arith.extf %1 : vector<1x8x16xbf16> to vector<1x8x16xf32>
    %cst = arith.constant 1.000000e+00 : f32
    %3 = vector.broadcast %cst : f32 to vector<1x8x16xf32>
    %4 = arith.subf %3, %2 : vector<1x8x16xf32>
    %cst_5 = arith.constant 6.000000e+02 : f32
    %5 = vector.broadcast %cst_5 : f32 to vector<1x8x16xf32>
    %6 = arith.mulf %4, %5 : vector<1x8x16xf32>
    %7 = arith.addf %0, %6 : vector<1x8x16xf32>
    %c0_6 = arith.constant 0 : index
    %c0_7 = arith.constant 0 : index
    %c16 = arith.constant 16 : index
    %8 = vector.load %arg2[%c0_6, %c0_7, %c16] : memref<1x8x32xf32, #tpu.memory_space<vmem>>, vector<1x8x16xf32>
    %c0_8 = arith.constant 0 : index
    %c0_9 = arith.constant 0 : index
    %c16_10 = arith.constant 16 : index
    %9 = vector.load %arg3[%c0_8, %c0_9, %c16_10] : memref<1x8x32xbf16, #tpu.memory_space<vmem>>, vector<1x8x16xbf16>
    %10 = arith.extf %9 : vector<1x8x16xbf16> to vector<1x8x16xf32>
    %cst_11 = arith.constant 1.000000e+00 : f32
    %11 = vector.broadcast %cst_11 : f32 to vector<1x8x16xf32>
    %12 = arith.subf %11, %10 : vector<1x8x16xf32>
    %cst_12 = arith.constant 6.000000e+02 : f32
    %13 = vector.broadcast %cst_12 : f32 to vector<1x8x16xf32>
    %14 = arith.mulf %12, %13 : vector<1x8x16xf32>
    %15 = arith.addf %8, %14 : vector<1x8x16xf32>
    %16 = arith.minimumf %7, %15 : vector<1x8x16xf32>
    %17 = arith.maximumf %2, %10 : vector<1x8x16xf32>
    %18 = vector.shape_cast %16 : vector<1x8x16xf32> to vector<1x8x8x2xf32>
    %cst_13 = arith.constant dense<0x7F800000> : vector<1x8x8xf32>
    %19 = vector.multi_reduction <minimumf>, %18, %cst_13 [3] : vector<1x8x8x2xf32> to vector<1x8x8xf32>
    %20 = vector.shape_cast %17 : vector<1x8x16xf32> to vector<1x8x8x2xf32>
    %cst_14 = arith.constant dense<0xFF800000> : vector<1x8x8xf32>
    %21 = vector.multi_reduction <maximumf>, %20, %cst_14 [3] : vector<1x8x8x2xf32> to vector<1x8x8xf32>
    %cst_15 = arith.constant 1.000000e+00 : f32
    %22 = vector.broadcast %cst_15 : f32 to vector<1x8x8xf32>
    %23 = arith.subf %22, %21 : vector<1x8x8xf32>
    %cst_16 = arith.constant 6.000000e+02 : f32
    %24 = vector.broadcast %cst_16 : f32 to vector<1x8x8xf32>
    %25 = arith.mulf %23, %24 : vector<1x8x8xf32>
    %26 = arith.subf %19, %25 : vector<1x8x8xf32>
    %c0_17 = arith.constant 0 : index
    %c0_18 = arith.constant 0 : index
    %c0_19 = arith.constant 0 : index
    %27 = vector.load %arg4[%c0_17, %c0_18, %c0_19] : memref<1x8x8xf32, #tpu.memory_space<vmem>>, vector<1x8x8xf32>
    tpu.vector_store %arg4[%c0_17, %c0_18, %c0_19], %26 {strides = array<i32>} : memref<1x8x8xf32, #tpu.memory_space<vmem>>, vector<1x8x8xf32>,
    %28 = arith.truncf %21 : vector<1x8x8xf32> to vector<1x8x8xbf16>
    %c0_20 = arith.constant 0 : index
    %c0_21 = arith.constant 0 : index
    %c0_22 = arith.constant 0 : index
    %29 = vector.load %arg5[%c0_20, %c0_21, %c0_22] : memref<1x8x8xbf16, #tpu.memory_space<vmem>>, vector<1x8x8xbf16>
    tpu.vector_store %arg5[%c0_20, %c0_21, %c0_22], %28 {strides = array<i32>} : memref<1x8x8xbf16, #tpu.memory_space<vmem>>, vector<1x8x8xbf16>,
    return
  }
  func.func @transform_0(%arg0: i32, %arg1: i32) -> (i32, i32, i32) {
    %c0_i32 = arith.constant 0 : i32
    %c0_i32_0 = arith.constant 0 : i32
    return %arg0, %arg1, %c0_i32 : i32, i32, i32
  }
  func.func @transform_1(%arg0: i32, %arg1: i32) -> (i32, i32, i32) {
    %c0_i32 = arith.constant 0 : i32
    %c0_i32_0 = arith.constant 0 : i32
    return %arg0, %arg1, %c0_i32 : i32, i32, i32
  }
  func.func @transform_2(%arg0: i32, %arg1: i32) -> (i32, i32, i32) {
    %c0_i32 = arith.constant 0 : i32
    %c0_i32_0 = arith.constant 0 : i32
    return %arg0, %arg1, %c0_i32 : i32, i32, i32
  }
  func.func @transform_3(%arg0: i32, %arg1: i32) -> (i32, i32, i32) {
    %c0_i32 = arith.constant 0 : i32
    %c0_i32_0 = arith.constant 0 : i32
    return %arg0, %arg1, %c0_i32 : i32, i32, i32
  }
}

</mosaic_0001>

<bundles_post_ra>
// kernel: tpu_custom_call.1
= control target key start
LH: loop header
LB: loop body
LE: loop exit
PB: predicated region body
PF: predicated region fallthrough
CT: control target
= control target key end

     0   :  { %9 = vsyncpa [#allocation3], 0  ;;  %s1697_s0 = inlined_call_operand.hbm [shape: f32[8,8,32], index: 0, kind: input, shape index: {}]   ;;  %s1698_s1 = inlined_call_operand.hbm [shape: bf16[8,8,32], index: 1, kind: input, shape index: {}]   ;;  %s1699_s2 = inlined_call_operand.hbm [shape: f32[8,8,8], index: 2, kind: output, shape index: {0}]   ;;  %s1700_s3 = inlined_call_operand.hbm [shape: bf16[8,8,8], index: 3, kind: output, shape index: {1}]  }
   0x1   :  { %11 = vsyncpa [#allocation3 + $0x1], 0 }
   0x2   :  { %12 = vsyncpa [#allocation6], 0 }
   0x3   :  { %14 = vsyncpa [#allocation6 + $0x1], 0 }
   0x4   :  { %15 = vsyncpa [#allocation4], 0 }
   0x5   :  { %17 = vsyncpa [#allocation4 + $0x1], 0 }
   0x6   :  { %18 = vsyncpa [#allocation9], 0 }
   0x7   :  { %20 = vsyncpa [#allocation9 + $0x1], 0  ;;  %s1331_s12 = smov 0   ;;  %s1333_s13 = smov 0  }
   0x8   :  { %s1335_s14 = smov 0   ;;  %s1337_s15 = smov 0  }
   0x9   :  { %s1339_s16 = smov 0   ;;  %s1341_s17 = smov 0  }
   0xa LB: > { %s1014_s18 = sadd.s32 4294967295, %s1294_s17   ;;  %s1015_s19 = sadd.s32 4294967294, %s1294_s17   ;;  %s1294_s17 = sphi %s1341_s17, %s26_s17   ;;  %s1290_s16 = sphi %s1339_s16, %s1719_s16   ;;  %s1286_s15 = sphi %s1337_s15, %s1718_s15   ;;  %s1282_s14 = sphi %s1335_s14, %s1717_s14   ;;  %s1278_s13 = sphi %s1333_s13, %s1716_s13   ;;  %s1274_s12 = sphi %s1331_s12, %s1715_s12  }
   0xb   : > { %s38_s20 = sadd.s32 1, %s1290_s16  ;;  %s47_s21 = sadd.s32 1, %s1282_s14 }
   0xc   : > { %p40_p0 = scmp.ge.s32.totalorder %s38_s20, 8  ;;  %p54_p1 = scmp.ne.s32.totalorder %s1282_s14, %s1278_s13 }
   0xd   : > { %p55_p2 = scmp.eq.s32.totalorder %s1294_s17, 0  ;;  %p60_p3 = scmp.ne.s32.totalorder %s1278_s13, %s1274_s12 }
   0xe   : > { %s1721_s20 = smov (%p40_p0, %s38_s20), 0  ;;  %p61_p5 = scmp.eq.s32.totalorder %s1014_s18, 0 }
   0xf   : > { %p1372_p4 = por %p55_p2, %p54_p1  ;;  %s42_s23 = ssub.s32 %s1290_s16, %s1721_s20 }
  0x10   : > { %p114_p6 = scmp.eq.s32.totalorder %s1014_s18, 7  ;;  %p45_p7 = scmp.eq.s32.totalorder %s42_s23, 0 }
  0x11   : > { %p1378_p8 = por %p61_p5, %p60_p3  ;;  %p120_p10 = scmp.eq.s32.totalorder %s1015_s19, 7 }
  0x12   : > { %p1382_p9 = por %p114_p6, %p54_p1  ;;  %p1055_p12 = scmp.lt.s32.totalorder %s1294_s17, 8 }
  0x13   : > { %s1704_s24 = scalar_select %p1378_p8, 1, 0 }
  0x14   : > { %s1705_s25 = scalar_select %p1382_p9, 1, 0 }
  0x15   : > { %s1387_s26 = scalar_select %p45_p7, %s1282_s14, %s47_s21  }
  0x16   : > { %p1389_p11 = por %p120_p10, %p60_p3  ;;  %s1395_s28 = sand.u32 1, %s1282_s14  }
  0x17   : > { %s1018_s29 = sshll.u32 %s1395_s28, 3  ;;  %s1019_s30 = sshll.u32 %s1290_s16, 7 }
  0x18   : > { %s1706_s27 = scalar_select %p1389_p11, 1, 0 }
  0x19   : > { %s1402_s6 = scalar_lea.hbm %s1697_s0, %s1019_s30  ;;  %s172_s7 = scalar_lea.vmem [#allocation2], %s1018_s29 }
  0x1a   : > { %s180_s8 = sshll.u32 %s172_s7, 4  ;;  %p1408_p13 = pnand %p1055_p12, %p1372_p4  ;;  %s1404_s8 = int_to_ptr.vmem [resolvable:$true] %s180_s8 }
  0x1b   : > { %s169_s10 = scalar_lea.sflag [#allocation3], %s1395_s28  ;;  %s1116_s11 = scalar_lea.hbm %s1402_s6, 128 }
  0x1c   : > { %p1117_p2 = scmp.ne.s32.totalorder %s1402_s6, %s1116_s11  ;;  %p1118_p3 = pneg %p1408_p13 }
  0x1d   : > { %s1121_s21 = scalar_lea.hbm %s1697_s0, 1024  ;;  %p1122_p4 = scmp.lt.u32.totalorder %s1402_s6, %s1697_s0 }
  0x1e   : > { %p1119_p5 = pnand %p1118_p3, %p1117_p2  ;;  %p1123_p7 = scmp.lt.u32.totalorder %s1121_s21, %s1116_s11 }
  0x1f   : > { %p1125_p12 = scmp.lt.u32.totalorder %s1116_s11, %s1402_s6 }
  0x20   : > { %p1120_p6 = pneg %p1119_p5  ;;  %p1124_p10 = por %p1123_p7, %p1122_p4 }
  0x22   : > { %p1126_p0 = por %p1125_p12, %p1124_p10 }
  0x24   : > { %p1127_p1 = pnand %p1126_p0, %p1120_p6 }
  0x26   : > { %1130 = shalt.err (!%p1127_p1)
}
  0x27   : > { %s1131_s29 = scalar_lea.vmem %s1404_s8, 128  ;;  %s1296_s30 = smov [#allocation2]  }
  0x28   : > { %p1132_p2 = scmp.ne.s32.totalorder %s1404_s8, %s1131_s29  ;;  %s1136_s4 = sshll.u32 %s1296_s30, 4  ;;  %s1137_s4 = int_to_ptr.vmem [resolvable:$false] %s1136_s4 }
  0x29   : > { %s1138_s5 = scalar_lea.vmem %s1137_s4, 256  ;;  %p1139_p9 = scmp.lt.s32.totalorder %s1404_s8, %s1137_s4 }
  0x2a   : > { %p1134_p5 = pnand %p1132_p2, %p1118_p3  ;;  %p1140_p4 = scmp.lt.s32.totalorder %s1138_s5, %s1131_s29 }
  0x2c   : > { %p1135_p11 = pneg %p1134_p5  ;;  %p1141_p7 = por %p1140_p4, %p1139_p9 }
  0x2e   : > { %p1142_p10 = pnand %p1141_p7, %p1135_p11 }
  0x30   : > { %1145 = shalt.err (!%p1142_p10)
}
  0x31   : > { %1044 = dma.hbm_to_vmem [thread:$0]  (!%p1408_p13), %s1402_s6, 128, %s1404_s8, %s169_s10  }
  0x32   : > { %p1708_p0 = scmp.lt.s32.totalorder %s1294_s17, 9  ;;  %p1709_p1 = scmp.ge.s32.totalorder %s1294_s17, 1 }
  0x33   : > { %s1020_s11 = sshll.u32 %s1395_s28, 2  ;;  %s1021_s18 = sshll.u32 %s1290_s16, 6 }
  0x34   : > { %p1444_p6 = pnand %p1709_p1, %p1708_p0  ;;  %s1453_s22 = scalar_lea.hbm %s1698_s1, %s1021_s18 }
  0x35   : > { %s191_s23 = scalar_lea.vmem [#allocation5], %s1020_s11  ;;  %s188_s6 = scalar_lea.sflag [#allocation6], %s1395_s28 }
  0x36   : > { %s1710_s7 = scalar_select %p1444_p6, 1, 0 }
  0x37   : > { %s199_s29 = sshll.u32 %s191_s23, 4  ;;  %s1146_s8 = scalar_lea.hbm %s1453_s22, 64  ;;  %s200_s29 = int_to_ptr.vmem [resolvable:$true] %s199_s29 }
  0x38   : > { %p1147_p9 = scmp.ne.s32.totalorder %s1453_s22, %s1146_s8  ;;  %s1151_s4 = scalar_lea.hbm %s1698_s1, 512 }
  0x39   : > { %p1152_p2 = scmp.lt.u32.totalorder %s1453_s22, %s1698_s1  ;;  %p1153_p5 = scmp.lt.u32.totalorder %s1151_s4, %s1146_s8 }
  0x3a   : > { %p1149_p11 = pnand %p1147_p9, %p1118_p3  ;;  %p1155_p7 = scmp.lt.u32.totalorder %s1146_s8, %s1453_s22 }
  0x3b   : > { %p1154_p4 = por %p1153_p5, %p1152_p2 }
  0x3c   : > { %p1150_p12 = pneg %p1149_p11 }
  0x3d   : > { %p1156_p10 = por %p1155_p7, %p1154_p4 }
  0x3f   : > { %p1157_p0 = pnand %p1156_p10, %p1150_p12 }
  0x41   : > { %1160 = shalt.err (!%p1157_p0)
}
  0x42   : > { %s1161_s28 = scalar_lea.vmem %s200_s29, 64  ;;  %s1297_s11 = smov [#allocation5]  }
  0x43   : > { %p1162_p1 = scmp.ne.s32.totalorder %s200_s29, %s1161_s28  ;;  %s1166_s19 = sshll.u32 %s1297_s11, 4  ;;  %s1167_s19 = int_to_ptr.vmem [resolvable:$false] %s1166_s19 }
  0x44   : > { %s1168_s21 = scalar_lea.vmem %s1167_s19, 128  ;;  %p1169_p8 = scmp.lt.s32.totalorder %s200_s29, %s1167_s19 }
  0x45   : > { %p1164_p9 = pnand %p1162_p1, %p1118_p3  ;;  %p1170_p6 = scmp.lt.s32.totalorder %s1168_s21, %s1161_s28 }
  0x47   : > { %p1165_p11 = pneg %p1164_p9  ;;  %p1171_p2 = por %p1170_p6, %p1169_p8 }
  0x49   : > { %p1172_p5 = pnand %p1171_p2, %p1165_p11 }
  0x4b   : > { %1175 = shalt.err (!%p1172_p5)
}
  0x4c   : > { %1047 = dma.hbm_to_vmem [thread:$0]  (!%p1408_p13), %s1453_s22, 64, %s200_s29, %s188_s6  }
  0x4d   : > { %p1711_p12 = scmp.ne.s32.totalorder %s1710_s7, 0 }
  0x4e   : > { %s1478_s23 = sand.u32 (!%p1711_p12), 1, %s1278_s13   ;;  %p1712_p8 = scmp.ne.s32.totalorder (!%p1711_p12), %s1704_s24, 0 }
  0x4f   : > { %208 = sbr.rel (%p1711_p12) target bundleno = 557 (0x22d), region = 28  ;;  %s1023_s8 = sshll.u32 (!%p1711_p12), %s1478_s23, 3 }
  0x50   : > { %s211_s10 = scalar_lea.sflag (!%p1711_p12), [#allocation3], %s1478_s23  ;;  %s214_s30 = scalar_lea.vmem (!%p1711_p12), [#allocation2], %s1023_s8 }
  0x56   : > { %1257 = dma.done.wait (%p1712_p8), %s211_s10, 128  }
  0x57   : > { %1259 = vsyncadd (%p1712_p8), %s211_s10, 4294967168  ;;  %s1024_s9 = sshll.u32 %s1478_s23, 2  ;;  %s220_s7 = scalar_lea.sflag [#allocation6], %s1478_s23 }
  0x58   : > { %s223_s22 = scalar_lea.vmem [#allocation5], %s1024_s9 }
  0x59   : > { %1261 = dma.done.wait (%p1712_p8), %s220_s7, 64  }
  0x5a   : > { %1263 = vsyncadd (%p1712_p8), %s220_s7, 4294967232  ;;  %v257_v0 = vld [vmem:[%s223_s22] sm:$0xf]  ;;  %s1298_s29 = smov 112   ;;  %v256_v3 = vld [vmem:[%s214_s30] sm:$0xff]  ;;  %s1299_s6 = smov 126   ;;  %v299_v10 = vlaneseq }
  0x5b   : > { %v258_v1 = vunpack.c.l.bf16 %v257_v0  ;;  %s1300_s4 = smov 122   ;;  %s1301_s5 = smov 124   ;;  %v1306_v16 = vmov 1983009808   ;;  %v1307_v24 = vmov 1934713408  }
  0x5c   : > { %s1302_s18 = smov 118   ;;  %s1303_s24 = smov 120   ;;  %v1505_v11 = vshrl.u32 %v299_v10, 7  ;;  %v670_v12 = vand.u32 127, %v299_v10  ;;  %v297_v17 = vunpack.c.l.s4 %v1306_v16  ;;  %v361_v25 = vunpack.c.l.s4 %v1307_v24 }
  0x5d   : > { %268 = vrot.lane.b32.xlu0 %v258_v1, %s1298_s29  ;;  %v259_v2 = vsub.f32 1.0, %v258_v1  ;;  %s1304_s28 = smov 114   ;;  %s1305_s11 = smov 116   ;;  %vm430_vm0 = vcmask 15360   ;;  %vm703_vm1 = vcmask 1041409   ;;  %vm705_vm2 = vcmask 1042434  }
  0x5e   : > { %v1508_v13 = vsub.s32 %v670_v12, %v1505_v11  ;;  %v298_v20 = vunpack.c.0.s8 %v297_v17  ;;  %v362_v35 = vunpack.c.0.s8 %v361_v25  ;;  %vm707_vm3 = vcmask 1043459   ;;  %s1030_s19 = sshll.u32 %s1286_s15, 6  ;;  %s255_s21 = scalar_lea.vmem [#allocation8], %s1024_s9 }
  0x5f   : > { %v260_v4 = vmul.f32 600.0, %v259_v2  ;;  %vm709_vm4 = vcmask 1044484   ;;  %vm711_vm5 = vcmask 1045509   ;;  %vm713_vm6 = vcmask 1046534   ;;  %s877_s10 = sshll.u32 %s255_s21, 4  ;;  %s1605_s9 = scalar_lea.hbm %s1700_s3, %s1030_s19  ;;  %s1607_s10 = int_to_ptr.vmem [resolvable:$true] %s877_s10 }
  0x60   : > { %v1511_v26 = vsub.s32 %v298_v20, %v1505_v11  ;;  %v1524_v47 = vsub.s32 %v362_v35, %v1505_v11  ;;  %vm715_vm7 = vcmask 1047559   ;;  %vm841_vm8 = vcmask 60416   ;;  %s849_s22 = scalar_lea.sflag [#allocation9], %s1478_s23  ;;  %p1713_p3 = scmp.ne.s32.totalorder %s1705_s25, 0 }
  0x61   : > { %v261_v5 = vadd.f32 %v260_v4, %v256_v3 }
  0x63   : > { %263 = vrot.lane.b32.xlu0 %v261_v5, %s1298_s29  ;;  %s1176_s29 = scalar_lea.vmem %s1607_s10, 64 }
  0x64   : > { %p1177_p13 = scmp.ne.s32.totalorder %s1607_s10, %s1176_s29 }
  0x66   : > { %p1178_p6 = pnand %p1177_p13, %p1713_p3 }
  0x68   : > { %p1179_p4 = pneg %p1178_p6 }
  0xcf   : > { %v269_v6 = vpop.permute.xlu0 %268 }
  0xd0   : > { %v271_v7 = vmax.f32 %v258_v1, %v269_v6 }
  0xd2   : > { %456 = vrot.lane.b32.xlu1 %v271_v7, %s1299_s6  ;;  %462 = vrot.lane.b32.xlu0 %v271_v7, %s1300_s4 }
  0xd5   : > { %v264_v8 = vpop.permute.xlu0 %263 }
  0xd6   : > { %459 = vrot.lane.b32.xlu1 %v271_v7, %s1301_s5  ;;  %468 = vrot.lane.b32.xlu0 %v271_v7, %s1302_s18  ;;  %v1496_v9 = vmin.f32 %v261_v5, %v264_v8 }
  0xda   : > { %465 = vrot.lane.b32.xlu1 %v271_v7, %s1303_s24  ;;  %474 = vrot.lane.b32.xlu0 %v271_v7, %s1304_s28 }
  0xde   : > { %471 = vrot.lane.b32.xlu1 %v271_v7, %s1305_s11  ;;  %276 = vrot.lane.b32.xlu0 %v1496_v9, %s1301_s5 }
  0xe2   : > { %282 = vrot.lane.b32.xlu0 %v1496_v9, %s1303_s24  ;;  %273 = vrot.lane.b32.xlu1 %v1496_v9, %s1299_s6  ;;  %s1309_s6 = smov [#allocation8]  }
  0xe6   : > { %288 = vrot.lane.b32.xlu0 %v1496_v9, %s1305_s11  ;;  %279 = vrot.lane.b32.xlu1 %v1496_v9, %s1300_s4  ;;  %s1180_s4 = sshll.u32 %s1309_s6, 4  ;;  %s1181_s4 = int_to_ptr.vmem [resolvable:$false] %s1180_s4 }
  0xe7   : > { %s1182_s5 = scalar_lea.vmem %s1181_s4, 128  ;;  %p1183_p7 = scmp.lt.s32.totalorder %s1607_s10, %s1181_s4 }
  0xe8   : > { %p1184_p10 = scmp.lt.s32.totalorder %s1182_s5, %s1176_s29 }
  0xea   : > { %285 = vrot.lane.b32.xlu1 %v1496_v9, %s1302_s18  ;;  %p1185_p0 = por %p1184_p10, %p1183_p7 }
  0xec   : > { %p1186_p1 = pnand %p1185_p0, %p1179_p4 }
  0xee   : > { %291 = vrot.lane.b32.xlu1 %v1496_v9, %s1304_s28 }
 0x144   : > { %v457_v14 = vpop.permute.xlu1 %456  ;;  %v463_v15 = vpop.permute.xlu0 %462 }
 0x145   : > { %v493_v27 = vcombine.low %v457_v14, %v463_v15  ;;  %v494_v31 = vcombine.high %v457_v14, %v463_v15 }
 0x147   : > { %v501_v38 = vrot.slane %v493_v27, %v1511_v26  ;;  %v508_v44 = vrot.slane %v494_v31, %v1511_v26 }
 0x148   : > { %v460_v18 = vpop.permute.xlu1 %459  ;;  %v469_v19 = vpop.permute.xlu0 %468 }
 0x149   : > { %v477_v21 = vcombine.low %v271_v7, %v460_v18  ;;  %v478_v28 = vcombine.high %v271_v7, %v460_v18 }
 0x14b   : > { %v485_v32 = vrot.slane %v477_v21, %v1511_v26  ;;  %v492_v39 = vrot.slane %v478_v28, %v1511_v26 }
 0x14c   : > { %v466_v22 = vpop.permute.xlu1 %465  ;;  %v475_v23 = vpop.permute.xlu0 %474 }
 0x14d   : > { %v525_v29 = vcombine.low %v469_v19, %v475_v23  ;;  %v526_v30 = vcombine.high %v469_v19, %v475_v23  ;;  %v541_v45 = vcombine.low %v485_v32, %v501_v38  ;;  %v557_v51 = vcombine.low %v492_v39, %v508_v44 }
 0x14e   : > { %v542_v53 = vcombine.high %v485_v32, %v501_v38  ;;  %v558_v60 = vcombine.high %v492_v39, %v508_v44 }
 0x14f   : > { %v533_v40 = vrot.slane %v525_v29, %v1511_v26  ;;  %v540_v41 = vrot.slane %v526_v30, %v1511_v26  ;;  %v549_v57 = vrot.slane %v541_v45, %v1524_v47  ;;  %v565_v63 = vrot.slane %v557_v51, %v1524_v47 }
 0x150   : > { %v472_v33 = vpop.permute.xlu1 %471  ;;  %v1514_v34 = vpop.permute.xlu0 %276  ;;  %v556_v2 = vrot.slane %v542_v53, %v1524_v47  ;;  %v572_v12 = vrot.slane %v558_v60, %v1524_v47 }
 0x151   : > { %v509_v36 = vcombine.low %v466_v22, %v472_v33  ;;  %v510_v37 = vcombine.high %v466_v22, %v472_v33  ;;  %v294_v0 = vcombine.low %v1496_v9, %v1514_v34  ;;  %v295_v27 = vcombine.high %v1496_v9, %v1514_v34 }
 0x153   : > { %v517_v42 = vrot.slane %v509_v36, %v1511_v26  ;;  %v524_v43 = vrot.slane %v510_v37, %v1511_v26  ;;  %v302_v14 = vrot.slane %v294_v0, %v1511_v26  ;;  %v309_v39 = vrot.slane %v295_v27, %v1511_v26 }
 0x154   : > { %v274_v46 = vpop.permute.xlu1 %273  ;;  %v283_v52 = vpop.permute.xlu0 %282 }
 0x155   : > { %v573_v48 = vcombine.low %v517_v42, %v533_v40  ;;  %v574_v49 = vcombine.high %v517_v42, %v533_v40  ;;  %v589_v50 = vcombine.low %v524_v43, %v540_v41  ;;  %v590_v55 = vcombine.high %v524_v43, %v540_v41 }
 0x157   : > { %v581_v54 = vrot.slane %v573_v48, %v1524_v47  ;;  %v597_v58 = vrot.slane %v589_v50, %v1524_v47  ;;  %v588_v59 = vrot.slane %v574_v49, %v1524_v47  ;;  %v604_v8 = vrot.slane %v590_v55, %v1524_v47 }
 0x158   : > { %v280_v56 = vpop.permute.xlu1 %279  ;;  %v289_v3 = vpop.permute.xlu0 %288 }
 0x159   : > { %v606_v61 = vcombine.high %v549_v57, %v581_v54  ;;  %v605_v62 = vcombine.low %v549_v57, %v581_v54  ;;  %v310_v1 = vcombine.low %v274_v46, %v280_v56  ;;  %v609_v7 = vcombine.low %v565_v63, %v597_v58 }
 0x15a   : > { %v607_v10 = vcombine.low %v556_v2, %v588_v59  ;;  %v326_v16 = vcombine.low %v283_v52, %v289_v3  ;;  %v311_v17 = vcombine.high %v274_v46, %v280_v56  ;;  %v327_v18 = vcombine.high %v283_v52, %v289_v3 }
 0x15b   : > { %v616_v5 = vsel %vm430_vm0, %v606_v61, -inf  ;;  %v613_v6 = vsel %vm430_vm0, %v605_v62, -inf  ;;  %v318_v15 = vrot.slane %v310_v1, %v1511_v26  ;;  %v625_v20 = vsel %vm430_vm0, %v609_v7, -inf }
 0x15c   : > { %v286_v4 = vpop.permute.xlu1 %285  ;;  %617 = vmax.xlane.f32.xlu1 %v616_v5  ;;  %614 = vmax.xlane.f32.xlu0 %v613_v6  ;;  %v611_v21 = vcombine.low %v572_v12, %v604_v8  ;;  %v619_v24 = vsel %vm430_vm0, %v607_v10, -inf  ;;  %v608_v25 = vcombine.high %v556_v2, %v588_v59  ;;  %v334_v29 = vrot.slane %v326_v16, %v1511_v26 }
 0x15d   : > { %v358_v28 = vcombine.low %v302_v14, %v318_v15  ;;  %v325_v32 = vrot.slane %v311_v17, %v1511_v26  ;;  %v359_v33 = vcombine.high %v302_v14, %v318_v15  ;;  %v341_v35 = vrot.slane %v327_v18, %v1511_v26 }
 0x15e   : > { %v631_v36 = vsel %vm430_vm0, %v611_v21, -inf  ;;  %v622_v9 = vsel %vm430_vm0, %v608_v25, -inf  ;;  %v610_v34 = vcombine.high %v565_v63, %v597_v58  ;;  %v612_v46 = vcombine.high %v572_v12, %v604_v8 }
 0x15f   : > { %v366_v41 = vrot.slane %v358_v28, %v1524_v47  ;;  %v374_v44 = vcombine.low %v309_v39, %v325_v32  ;;  %v373_v49 = vrot.slane %v359_v33, %v1524_v47  ;;  %v375_v53 = vcombine.high %v309_v39, %v325_v32 }
 0x160   : > { %v292_v19 = vpop.permute.xlu1 %291  ;;  %626 = vmax.xlane.f32.xlu1 %v625_v20  ;;  %620 = vmax.xlane.f32.xlu0 %v619_v24  ;;  %v628_v45 = vsel %vm430_vm0, %v610_v34, -inf  ;;  %v634_v54 = vsel %vm430_vm0, %v612_v46, -inf }
 0x161   : > { %v342_v22 = vcombine.low %v286_v4, %v292_v19  ;;  %v343_v23 = vcombine.high %v286_v4, %v292_v19  ;;  %v382_v56 = vrot.slane %v374_v44, %v1524_v47  ;;  %v389_v62 = vrot.slane %v375_v53, %v1524_v47 }
 0x163   : > { %v350_v30 = vrot.slane %v342_v22, %v1511_v26  ;;  %v357_v31 = vrot.slane %v343_v23, %v1511_v26 }
 0x164   : > { %632 = vmax.xlane.f32.xlu1 %v631_v36  ;;  %623 = vmax.xlane.f32.xlu0 %v622_v9 }
 0x165   : > { %v390_v37 = vcombine.low %v334_v29, %v350_v30  ;;  %v391_v38 = vcombine.high %v334_v29, %v350_v30  ;;  %v406_v40 = vcombine.low %v341_v35, %v357_v31  ;;  %v407_v50 = vcombine.high %v341_v35, %v357_v31 }
 0x167   : > { %v398_v42 = vrot.slane %v390_v37, %v1524_v47  ;;  %v405_v43 = vrot.slane %v391_v38, %v1524_v47  ;;  %v414_v52 = vrot.slane %v406_v40, %v1524_v47  ;;  %v421_v59 = vrot.slane %v407_v50, %v1524_v47 }
 0x168   : > { %629 = vmax.xlane.f32.xlu0 %v628_v45  ;;  %v1308_v47 = vmov 839922192  }
 0x169   : > { %v423_v48 = vcombine.high %v366_v41, %v398_v42  ;;  %v424_v26 = vcombine.low %v373_v49, %v405_v43  ;;  %v422_v55 = vcombine.low %v366_v41, %v398_v42  ;;  %v426_v58 = vcombine.low %v382_v56, %v414_v52 }
 0x16a   : > { %v425_v61 = vcombine.high %v373_v49, %v405_v43  ;;  %v428_v0 = vcombine.low %v389_v62, %v421_v59  ;;  %v427_v2 = vcombine.high %v382_v56, %v414_v52  ;;  %v429_v5 = vcombine.high %v389_v62, %v421_v59 }
 0x16b   : > { %v434_v51 = vsel %vm430_vm0, %v423_v48, inf  ;;  %v437_v57 = vsel %vm430_vm0, %v424_v26, inf  ;;  %v431_v60 = vsel %vm430_vm0, %v422_v55, inf  ;;  %v443_v63 = vsel %vm430_vm0, %v426_v58, inf }
 0x16c   : > { %435 = vmin.xlane.f32.xlu1 %v434_v51  ;;  %635 = vmax.xlane.f32.xlu0 %v634_v54  ;;  %v440_v1 = vsel %vm430_vm0, %v425_v61, inf  ;;  %v449_v3 = vsel %vm430_vm0, %v428_v0, inf  ;;  %v446_v4 = vsel %vm430_vm0, %v427_v2, inf  ;;  %v452_v6 = vsel %vm430_vm0, %v429_v5, inf }
 0x16d   : > { %v737_v7 = vunpack.c.l.s4 %v1308_v47 }
 0x16f   : > { %v738_v8 = vunpack.c.0.s8 %v737_v7 }
 0x170   : > { %438 = vmin.xlane.f32.xlu1 %v437_v57  ;;  %432 = vmin.xlane.f32.xlu0 %v431_v60 }
 0x171   : > { %v741_v10 = vsub.s32 %v738_v8, %v1505_v11 }
 0x174   : > { %444 = vmin.xlane.f32.xlu1 %v443_v63  ;;  %441 = vmin.xlane.f32.xlu0 %v440_v1 }
 0x178   : > { %450 = vmin.xlane.f32.xlu1 %v449_v3  ;;  %447 = vmin.xlane.f32.xlu0 %v446_v4 }
 0x17c   : > { %453 = vmin.xlane.f32.xlu0 %v452_v6 }
 0x1e9   : > { %v618_v12 = vpop.xlane.xlu1 %617  ;;  %v615_v15 = vpop.xlane.xlu0 %614 }
 0x1ea   : > { %v721_v14 = vpack.c.bf16 %v618_v12, %v618_v12  ;;  %v720_v16 = vpack.c.bf16 %v615_v15, %v615_v15  ;;  %v638_v41 = vsub.f32 1.0, %v618_v12  ;;  %v637_v49 = vsub.f32 1.0, %v615_v15 }
 0x1ec   : > { %v749_v17 = vrot.slane %v721_v14, %v741_v10  ;;  %v742_v18 = vrot.slane %v720_v16, %v741_v10  ;;  %v646_v52 = vmul.f32 600.0, %v638_v41  ;;  %v645_v60 = vmul.f32 600.0, %v637_v49 }
 0x1ed   : > { %v627_v19 = vpop.xlane.xlu1 %626  ;;  %v621_v22 = vpop.xlane.xlu0 %620 }
 0x1ee   : > { %v793_v20 = vunpack.c.l.b16 %v749_v17  ;;  %v724_v21 = vpack.c.bf16 %v627_v19, %v627_v19  ;;  %v792_v23 = vunpack.c.l.b16 %v742_v18  ;;  %v722_v24 = vpack.c.bf16 %v621_v22, %v621_v22 }
 0x1ef   : > { %v639_v45 = vsub.f32 1.0, %v621_v22  ;;  %v641_v55 = vsub.f32 1.0, %v627_v19 }
 0x1f0   : > { %v807_v25 = vrot.slane %v793_v20, %v1508_v13  ;;  %v770_v27 = vrot.slane %v724_v21, %v741_v10  ;;  %v803_v28 = vrot.slane %v792_v23, %v1508_v13  ;;  %v756_v29 = vrot.slane %v722_v24, %v741_v10 }
 0x1f1   : > { %v1573_v11 = vpop.xlane.xlu1 %632  ;;  %v624_v32 = vpop.xlane.xlu0 %623  ;;  %v647_v56 = vmul.f32 600.0, %v639_v45  ;;  %v649_v6 = vmul.f32 600.0, %v641_v55 }
 0x1f2   : > { %v796_v30 = vunpack.c.l.b16 %v770_v27  ;;  %v726_v31 = vpack.c.bf16 %v1573_v11, %v1573_v11  ;;  %v794_v33 = vunpack.c.l.b16 %v756_v29  ;;  %v723_v35 = vpack.c.bf16 %v624_v32, %v624_v32 }
 0x1f3   : > { %v832_v36 = vsel %vm703_vm1, %v807_v25, %v803_v28  ;;  %v640_v57 = vsub.f32 1.0, %v624_v32  ;;  %v643_v47 = vsub.f32 1.0, %v1573_v11 }
 0x1f4   : > { %v819_v37 = vrot.slane %v796_v30, %v1508_v13  ;;  %v784_v38 = vrot.slane %v726_v31, %v741_v10  ;;  %v811_v9 = vrot.slane %v794_v33, %v1508_v13  ;;  %v763_v34 = vrot.slane %v723_v35, %v741_v10 }
 0x1f5   : > { %v630_v40 = vpop.xlane.xlu0 %629  ;;  %v648_v7 = vmul.f32 600.0, %v640_v57  ;;  %v651_v23 = vmul.f32 600.0, %v643_v47 }
 0x1f6   : > { %v798_v39 = vunpack.c.l.b16 %v784_v38  ;;  %v795_v42 = vunpack.c.l.b16 %v763_v34  ;;  %v725_v43 = vpack.c.bf16 %v630_v40, %v630_v40  ;;  %v833_v44 = vsel %vm705_vm2, %v811_v9, %v832_v36 }
 0x1f7   : > { %v642_v14 = vsub.f32 1.0, %v630_v40 }
 0x1f8   : > { %v827_v46 = vrot.slane %v798_v39, %v1508_v13  ;;  %v815_v50 = vrot.slane %v795_v42, %v1508_v13  ;;  %v777_v51 = vrot.slane %v725_v43, %v741_v10 }
 0x1f9   : > { %v436_v48 = vpop.xlane.xlu1 %435  ;;  %v1583_v26 = vpop.xlane.xlu0 %635  ;;  %v650_v27 = vmul.f32 600.0, %v642_v14 }
 0x1fa   : > { %v797_v53 = vunpack.c.l.b16 %v777_v51  ;;  %v727_v54 = vpack.c.bf16 %v1583_v26, %v1583_v26  ;;  %v834_v59 = vsel %vm707_vm3, %v815_v50, %v833_v44  ;;  %v654_v62 = vsub.f32 %v436_v48, %v646_v52 }
 0x1fb   : > { %v835_v2 = vsel %vm709_vm4, %v819_v37, %v834_v59  ;;  %v644_v28 = vsub.f32 1.0, %v1583_v26 }
 0x1fc   : > { %v823_v61 = vrot.slane %v797_v53, %v1508_v13  ;;  %v791_v63 = vrot.slane %v727_v54, %v741_v10  ;;  %v678_v10 = vrot.slane %v654_v62, %v1508_v13 }
 0x1fd   : > { %v439_v58 = vpop.xlane.xlu1 %438  ;;  %v433_v1 = vpop.xlane.xlu0 %432 }
 0x1fe   : > { %v655_v0 = vsub.f32 %v439_v58, %v647_v56  ;;  %v799_v3 = vunpack.c.l.b16 %v791_v63  ;;  %v653_v4 = vsub.f32 %v433_v1, %v645_v60  ;;  %v836_v5 = vsel %vm711_vm5, %v823_v61, %v835_v2 }
 0x1ff   : > { %v837_v12 = vsel %vm713_vm6, %v827_v46, %v836_v5 }
 0x200   : > { %v831_v15 = vrot.slane %v799_v3, %v1508_v13  ;;  %v674_v16 = vrot.slane %v653_v4, %v1508_v13  ;;  %v682_v17 = vrot.slane %v655_v0, %v1508_v13 }
 0x201   : > { %v445_v8 = vpop.xlane.xlu1 %444  ;;  %v442_v19 = vpop.xlane.xlu0 %441 }
 0x202   : > { %v657_v18 = vsub.f32 %v445_v8, %v649_v6  ;;  %v704_v20 = vsel %vm703_vm1, %v678_v10, %v674_v16  ;;  %v656_v21 = vsub.f32 %v442_v19, %v648_v7  ;;  %v838_v22 = vsel %vm715_vm7, %v831_v15, %v837_v12 }
 0x203   : > { %v839_v25 = vpack.c.b16 %v838_v22, %v838_v22  ;;  %v706_v30 = vsel %vm705_vm2, %v682_v17, %v704_v20 }
 0x204   : > { %v686_v29 = vrot.slane %v656_v21, %v1508_v13  ;;  %v690_v11 = vrot.slane %v657_v18, %v1508_v13 }
 0x205   : > { %v451_v24 = vpop.xlane.xlu1 %450  ;;  %v448_v32 = vpop.xlane.xlu0 %447  ;;  %842 = vst.msk [vmem:[%s255_s21] sm:$0xf] %vm841_vm8, %v839_v25 }
 0x206   : > { %v659_v31 = vsub.f32 %v451_v24, %v651_v23  ;;  %v708_v33 = vsel %vm707_vm3, %v686_v29, %v706_v30  ;;  %v658_v35 = vsub.f32 %v448_v32, %v650_v27 }
 0x207   : > { %1189 = shalt.err (!%p1186_p1)
}
 0x208   : > { %s1190_s18 = scalar_lea.hbm %s1605_s9, 64  ;;  %s1194_s11 = scalar_lea.hbm %s1700_s3, 512 }
 0x209   : > { %p1191_p9 = scmp.ne.s32.totalorder %s1605_s9, %s1190_s18  ;;  %p1195_p5 = scmp.lt.u32.totalorder %s1605_s9, %s1700_s3 }
 0x20a   : > { %p1196_p12 = scmp.lt.u32.totalorder %s1194_s11, %s1190_s18  ;;  %p1198_p13 = scmp.lt.u32.totalorder %s1190_s18, %s1605_s9 }
 0x20b   : > { %p1192_p11 = pnand %p1191_p9, %p1713_p3 }
 0x20c   : > { %p1197_p8 = por %p1196_p12, %p1195_p5 }
 0x20d   : > { %p1193_p2 = pneg %p1192_p11 }
 0x20e   : > { %p1199_p6 = por %p1198_p13, %p1197_p8 }
 0x210   : > { %p1200_p4 = pnand %p1199_p6, %p1193_p2 }
 0x212   : > { %1203 = shalt.err (!%p1200_p4)
}
 0x213   : > { %1038 = dma.vmem_to_hbm [thread:$0]  (%p1713_p3), %s1607_s10, 64, %s1605_s9, %s849_s22   ;;  %v652_v36 = vmul.f32 600.0, %v644_v28  ;;  %v694_v37 = vrot.slane %v658_v35, %v1508_v13  ;;  %v698_v38 = vrot.slane %v659_v31, %v1508_v13  ;;  %v710_v9 = vsel %vm709_vm4, %v690_v11, %v708_v33  ;;  %v454_v34 = vpop.xlane.xlu0 %453 }
 0x214   : > { %s1029_s30 = sshll.u32 %s1286_s15, 7  ;;  %s248_s7 = scalar_lea.vmem [#allocation7], %s1023_s8  ;;  %vm718_vm9 = vcmask 64512  }
 0x215   : > { %v712_v39 = vsel %vm711_vm5, %v694_v37, %v710_v9  ;;  %v660_v40 = vsub.f32 %v454_v34, %v652_v36  ;;  %s863_s29 = sshll.u32 %s248_s7, 4  ;;  %s1648_s22 = scalar_lea.hbm %s1699_s2, %s1029_s30  ;;  %s1650_s29 = int_to_ptr.vmem [resolvable:$true] %s863_s29 }
 0x216   : > { %v714_v42 = vsel %vm713_vm6, %v698_v38, %v712_v39  ;;  %s844_s15 = scalar_lea.sflag [#allocation4], %s1478_s23  ;;  %s1204_s8 = scalar_lea.vmem %s1650_s29, 128 }
 0x217   : > { %v702_v41 = vrot.slane %v660_v40, %v1508_v13  ;;  %p1205_p7 = scmp.ne.s32.totalorder %s1650_s29, %s1204_s8  ;;  %s1310_s6 = smov [#allocation7]  }
 0x218   : > { %s1208_s4 = sshll.u32 %s1310_s6, 4  ;;  %s1209_s4 = int_to_ptr.vmem [resolvable:$false] %s1208_s4 }
 0x219   : > { %v716_v43 = vsel %vm715_vm7, %v702_v41, %v714_v42  ;;  %p1206_p10 = pnand %p1205_p7, %p1713_p3  ;;  %s1210_s5 = scalar_lea.vmem %s1209_s4, 256 }
 0x21a   : > { %719 = vst.msk [vmem:[%s248_s7] sm:$0xff] %vm718_vm9, %v716_v43  ;;  %p1211_p1 = scmp.lt.s32.totalorder %s1650_s29, %s1209_s4  ;;  %p1212_p9 = scmp.lt.s32.totalorder %s1210_s5, %s1204_s8 }
 0x21b   : > { %p1207_p0 = pneg %p1206_p10 }
 0x21c   : > { %p1213_p11 = por %p1212_p9, %p1211_p1 }
 0x21e   : > { %p1214_p2 = pnand %p1213_p11, %p1207_p0 }
 0x220   : > { %1217 = shalt.err (!%p1214_p2)
}
 0x221   : > { %s1218_s23 = scalar_lea.hbm %s1648_s22, 128  ;;  %s1222_s28 = scalar_lea.hbm %s1699_s2, 1024 }
 0x222   : > { %p1219_p5 = scmp.ne.s32.totalorder %s1648_s22, %s1218_s23  ;;  %p1223_p13 = scmp.lt.u32.totalorder %s1648_s22, %s1699_s2 }
 0x223   : > { %p1224_p6 = scmp.lt.u32.totalorder %s1222_s28, %s1218_s23  ;;  %p1226_p7 = scmp.lt.u32.totalorder %s1218_s23, %s1648_s22 }
 0x224   : > { %p1220_p12 = pnand %p1219_p5, %p1713_p3 }
 0x225   : > { %p1225_p4 = por %p1224_p6, %p1223_p13 }
 0x226   : > { %p1221_p8 = pneg %p1220_p12 }
 0x227   : > { %p1227_p10 = por %p1226_p7, %p1225_p4 }
 0x229   : > { %p1228_p0 = pnand %p1227_p10, %p1221_p8 }
 0x22b   : > { %1231 = shalt.err (!%p1228_p0)
}
 0x22c   : > { %1037 = dma.vmem_to_hbm [thread:$0]  (%p1713_p3), %s1650_s29, 128, %s1648_s22, %s844_s15  }
 0x22d PF: > { %p1056_p1 = scmp.ge.s32.totalorder %s1294_s17, 2  ;;  %s889_s21 = sand.u32 1, %s1274_s12  }
 0x22e   : > { %p1714_p9 = scmp.ne.s32.totalorder %s1706_s27, 0  ;;  %s890_s30 = scalar_lea.sflag [#allocation4], %s889_s21 }
 0x230   : > { %p1049_p11 = pnand %p1056_p1, %p1714_p9 }
 0x232   : > { %1265 = dma.done.wait (!%p1049_p11), %s890_s30, 128  }
 0x233   : > { %1267 = vsyncadd (!%p1049_p11), %s890_s30, 4294967168  ;;  %s899_s7 = scalar_lea.sflag [#allocation9], %s889_s21 }
 0x234   : > { %1269 = dma.done.wait (!%p1049_p11), %s899_s7, 64  }
 0x235   : > { %1271 = vsyncadd (!%p1049_p11), %s899_s7, 4294967232  ;;  %s26_s17 = sadd.s32 1, %s1294_s17   ;;  %s1715_s12 = smov %s1278_s13 }
 0x236   : > { %p23_p2 = scmp.ge.s32.totalorder %s26_s17, 10   ;;  %s1716_s13 = smov %s1282_s14 }
 0x237   : > { %s1717_s14 = smov %s1387_s26  ;;  %s1718_s15 = smov %s1290_s16 }
 0x238   : > { %s1719_s16 = smov %s1721_s20  ;;  %25 = sbr.rel (!%p23_p2) target bundleno = 10 (0xa), region = 103 }
 0x23f   :  { %904 = vsyncpa [#allocation3], 1 }
 0x240   :  { %906 = vsyncpa [#allocation3 + $0x1], 1 }
 0x241   :  { %907 = vsyncpa [#allocation6], 1 }
 0x242   :  { %909 = vsyncpa [#allocation6 + $0x1], 1 }
 0x243   :  { %910 = vsyncpa [#allocation4], 1 }
 0x244   :  { %912 = vsyncpa [#allocation4 + $0x1], 1 }
 0x245   :  { %913 = vsyncpa [#allocation9], 1 }
 0x246   :  { %915 = vsyncpa [#allocation9 + $0x1], 1 }

</bundles_post_ra>
